<compile_context>
chip_gen: v5e
topology: v5e:2x2
jax: 0.10.0
libtpu: 0.0.40
codegen_flags: <defaults>
</compile_context>

<pallas_src>
import functools
import math

import jax
import jax.numpy as jnp
from jax.experimental import pallas as pl
from jax.experimental.pallas import tpu as pltpu

EPS = 1e-6
NEG_INF = -1.0e9


def _vmem_capacity_bytes():
    """Generation-aware VMEM capacity (v5e/v6e: 128 MiB, v7x: 64 MiB), with a safe fallback."""
    try:
        cap = getattr(pltpu.get_tpu_info(), "vmem_capacity_bytes", None)
        if cap:
            return int(cap)
    except Exception:
        pass
    return 64 * 1024 * 1024  # conservative default == v7x per-core VMEM


_VMEM_CAP = _vmem_capacity_bytes()
# Leave headroom for compiler-internal scratch; cap well below physical capacity.
_VMEM_LIMIT = max(32 * 1024 * 1024, min(int(0.80 * _VMEM_CAP), 112 * 1024 * 1024))

# TODO(synk): once pipeline_mode=pl.Buffered(1) on constant-index weight BlockSpecs is
# universally supported at the top-level pallas_call, use it to drop the 2x weight
# double-buffering counted in the budgets below (biggest win on v7x's 64 MiB VMEM).


# --------------------------- shared LN helper (in-kernel) ---------------------------
def _ln_rows(x, gamma, beta):
    """torch-style row LayerNorm: gamma*(x-mean)/(std_unbiased+eps)+beta, stats in f32."""
    xf = x.astype(jnp.float32)
    d = xf.shape[-1]
    mean = jnp.mean(xf, axis=-1, keepdims=True)
    xc = xf - mean
    var = jnp.sum(xc * xc, axis=-1, keepdims=True) * (1.0 / (d - 1))  # unbiased (torch .std)
    inv = pl.reciprocal(jnp.sqrt(var) + EPS, approx=False)            # exact (std+eps)^-1
    return xc * (gamma.astype(jnp.float32) * inv) + beta.astype(jnp.float32)


# ----------------------- fused LN + multi-head attention + residual -----------------
def _mha_kernel(xq_ref, xkv_ref, mask_ref, g_ref, be_ref,
                wq_ref, bq_ref, wk_ref, bk_ref, wv_ref, bv_ref, wo_ref, bo_ref,
                z1_ref, wn_ref, *, n_heads):
    x_q = xq_ref[...]                       # (tq, D) residual / query rows, native dtype
    x_kv = xkv_ref[...]                     # (S, D) full sequence for K/V
    cdt = x_q.dtype                         # matmul operand dtype (bf16 stays bf16)
    gamma = g_ref[...]
    beta = be_ref[...]
    D = x_q.shape[-1]
    hd = D // n_heads

    # Fused pre-norm (no standalone LayerNorm kernel, no xn HBM round trip).
    xn_q = _ln_rows(x_q, gamma, beta).astype(cdt)
    xn_kv = _ln_rows(x_kv, gamma, beta).astype(cdt)
    # TODO(synk): for very long sequences, hoist the K/V projection out of the q-block
    # loop (carried scratch / separate kernel) instead of recomputing it per query block.

    # Full-width projections (MXU lane-dense); 1/sqrt(head_dim) is pre-folded into wq/bq.
    q = (jnp.dot(xn_q, wq_ref[...], preferred_element_type=jnp.float32)
         + bq_ref[...].astype(jnp.float32)).astype(cdt)
    k = (jnp.dot(xn_kv, wk_ref[...], preferred_element_type=jnp.float32)
         + bk_ref[...].astype(jnp.float32)).astype(cdt)
    v = (jnp.dot(xn_kv, wv_ref[...], preferred_element_type=jnp.float32)
         + bv_ref[...].astype(jnp.float32)).astype(cdt)

    # Mask -> additive bias hoisted out of the head loop (single VPU compare+select pass).
    bias = jnp.where(mask_ref[...] == 0, jnp.float32(NEG_INF), jnp.float32(0.0))  # (tq, S)

    wsum = jnp.zeros(bias.shape, jnp.float32)
    ctx_heads = []
    for h in range(n_heads):                # static unroll; per-head scores/softmax/PV only
        sl = slice(h * hd, (h + 1) * hd)
        qh, kh, vh = q[:, sl], k[:, sl], v[:, sl]
        s = jax.lax.dot_general(qh, kh, (((1,), (1,)), ((), ())),
                                preferred_element_type=jnp.float32) + bias       # (tq, S)
        m = jnp.max(s, axis=-1, keepdims=True)
        e = jnp.exp(s - m)
        w = e * pl.reciprocal(jnp.sum(e, axis=-1, keepdims=True), approx=True)   # EUP slot
        # TODO(synk): dropout on attention weights treated as identity (inference mode).
        wsum = wsum + w
        ctx_heads.append(jnp.dot(w.astype(cdt), vh, preferred_element_type=jnp.float32))

    # Single full-width output projection on the concatenated heads.
    ctx = jnp.concatenate(ctx_heads, axis=-1).astype(cdt)                         # (tq, D)
    z = (jnp.dot(ctx, wo_ref[...], preferred_element_type=jnp.float32)
         + bo_ref[...].astype(jnp.float32))
    z1_ref[...] = (x_q.astype(jnp.float32) + z).astype(z1_ref.dtype)   # fused residual add
    # Returned attention map kept f32 to match the reference dtype exactly.
    wn_ref[...] = (wsum * (1.0 / n_heads)).astype(wn_ref.dtype)


def _pick_q_tile(S, D, itemsize, max_tile_q):
    """Largest query-row tile fitting the VMEM budget (counting K/V, weights, outputs)."""
    sub = 16 if itemsize == 2 else 8
    if S <= max_tile_q:
        return S                                           # full-dim block (always legal)
    budget = int(_VMEM_LIMIT * 0.6)

    def step_bytes(tq):
        return (2 * itemsize * (tq * D + S * D + tq * S + tq * D)  # 2x-buffered xq, xkv, mask, z1
                + 2 * 4 * tq * S                                   # 2x-buffered f32 wn output
                + 4 * (2 * S * D + tq * D)                         # f32 K, V, Q values
                + 4 * 3 * tq * S                                   # scores / exp / wsum live
                + 2 * itemsize * (4 * D * D + 5 * D))              # 2x-buffered weights+biases+LN

    tq = max(sub, (min(max_tile_q, S) // sub) * sub)
    while tq > sub and step_bytes(tq) > budget:
        tq = max(sub, ((tq // 2) // sub) * sub)
    return tq


def mha_block(x, mask, a_2, b_2, attn_params, n_heads, *, max_tile_q=256):
    B, S, D = x.shape
    hd = D // n_heads
    wq, bq, wk, bk, wv, bv, wo, bo = attn_params

    # Fold the 1/sqrt(head_dim) score scale into W_q / b_q once (weight-only pre-scale).
    inv_scale = 1.0 / math.sqrt(hd)
    wq_s = (wq * inv_scale).astype(wq.dtype)
    bq_s = (bq * inv_scale).astype(bq.dtype)
    gamma = a_2.reshape(1, D)
    beta = b_2.reshape(1, D)

    itemsize = jnp.dtype(x.dtype).itemsize
    tq = _pick_q_tile(S, D, itemsize, max_tile_q)
    nq = pl.cdiv(S, tq)

    kernel = functools.partial(_mha_kernel, n_heads=n_heads)

    xq_spec = pl.BlockSpec((None, tq, D), lambda b, qi: (b, qi, 0))
    xkv_spec = pl.BlockSpec((None, S, D), lambda b, qi: (b, 0, 0))   # constant over q blocks
    mk_spec = pl.BlockSpec((None, tq, S), lambda b, qi: (b, qi, 0))
    vec_spec = pl.BlockSpec((1, D), lambda b, qi: (0, 0))            # resident (constant idx)
    w_spec = pl.BlockSpec((D, D), lambda b, qi: (0, 0))

    z1, wn = pl.pallas_call(
        kernel,
        out_shape=(jax.ShapeDtypeStruct((B, S, D), x.dtype),
                   jax.ShapeDtypeStruct((B, S, S), jnp.float32)),
        grid_spec=pltpu.PrefetchScalarGridSpec(
            num_scalar_prefetch=0,
            grid=(B, nq),
            in_specs=[xq_spec, xkv_spec, mk_spec, vec_spec, vec_spec,
                      w_spec, vec_spec, w_spec, vec_spec, w_spec, vec_spec,
                      w_spec, vec_spec],
            out_specs=[pl.BlockSpec((None, tq, D), lambda b, qi: (b, qi, 0)),
                       pl.BlockSpec((None, tq, S), lambda b, qi: (b, qi, 0))],
        ),
        compiler_params=pltpu.CompilerParams(
            dimension_semantics=("parallel", "parallel"),
            vmem_limit_bytes=_VMEM_LIMIT,
        ),
    )(x, x, mask, gamma, beta, wq_s, bq_s, wk, bk, wv, bv, wo, bo)
    return z1, wn


# ------------------- fused LN + position-wise feed forward + residual ---------------
def _ffn_kernel(z1_ref, g_ref, be_ref, w1_ref, b1_ref, w2_ref, b2_ref, o_ref, acc_ref):
    f = pl.program_id(1)

    @pl.when(f == 0)
    def _():
        acc_ref[...] = jnp.zeros_like(acc_ref)

    z1 = z1_ref[...]                                        # (tr, D) residual rows
    cdt = z1.dtype
    xn = _ln_rows(z1, g_ref[...], be_ref[...]).astype(cdt)  # fused pre-norm
    h = (jnp.dot(xn, w1_ref[...], preferred_element_type=jnp.float32)
         + b1_ref[...].astype(jnp.float32))
    h = jnp.maximum(h, 0.0)
    # TODO(synk): dropout after ReLU / on the sublayer output treated as identity.
    acc_ref[...] += jnp.dot(h.astype(cdt), w2_ref[...], preferred_element_type=jnp.float32)
    # Written every step; the output block only reaches HBM after the last hidden-dim
    # block for this row tile (output index map is constant over grid axis 1).
    o_ref[...] = (z1.astype(jnp.float32) + acc_ref[...]
                  + b2_ref[...].astype(jnp.float32)).astype(o_ref.dtype)


def _pick_ffn_tiles(rows, D, F, itemsize, max_tile_rows):
    """Row / hidden tiles within the VMEM budget, counting double-buffered weight blocks
    and the f32 hidden activation + accumulator (v7x 64 MiB concern)."""
    sub = 16 if itemsize == 2 else 8
    budget = int(_VMEM_LIMIT * 0.6)

    def wbytes(tf):
        # double-buffered w1 (D,tf), b1 (1,tf), w2 (tf,D), b2 / gamma / beta (1,D)
        return 2 * itemsize * (2 * D * tf + tf + 3 * D)

    tf = F
    if wbytes(F) > budget // 2:
        for cand in (4096, 2048, 1024, 512, 256, 128):
            if cand < F and F % cand == 0 and wbytes(cand) <= budget // 2:
                tf = cand
                break
        # If F has no suitable multiple-of-128 divisor we keep full-F weight blocks and
        # rely on a smaller row tile below.

    def step_bytes(tr):
        return (4 * tr * D * itemsize   # double-buffered (tr,D) z1-in + z2-out row blocks
                + wbytes(tf)
                + 4 * tr * tf           # f32 hidden activation
                + 4 * tr * D)           # f32 accumulator scratch

    if rows <= sub:
        return rows, tf
    tr = max(sub, (min(max_tile_rows, rows) // sub) * sub)
    while tr > sub and step_bytes(tr) > budget:
        tr = max(sub, ((tr // 2) // sub) * sub)
    return tr, tf


def ffn_block(z1, a_2, b_2, ffn_params, *, max_tile_rows=1024):
    orig_shape = z1.shape
    D = orig_shape[-1]
    w1, b1, w2, b2 = ffn_params
    F = w1.shape[-1]
    rows = math.prod(orig_shape[:-1])
    z1_2 = z1.reshape(rows, D)

    itemsize = jnp.dtype(z1.dtype).itemsize
    tr, tf = _pick_ffn_tiles(rows, D, F, itemsize, max_tile_rows)
    nr = pl.cdiv(rows, tr)       # ragged tail handled by Pallas (no jnp.pad round trip)
    nf = F // tf                 # tf always divides F (or equals it)
    gamma = a_2.reshape(1, D)
    beta = b_2.reshape(1, D)

    out = pl.pallas_call(
        _ffn_kernel,
        out_shape=jax.ShapeDtypeStruct((rows, D), z1.dtype),
        grid_spec=pltpu.PrefetchScalarGridSpec(
            num_scalar_prefetch=0,
            grid=(nr, nf),
            in_specs=[
                pl.BlockSpec((tr, D), lambda i, f: (i, 0)),
                pl.BlockSpec((1, D), lambda i, f: (0, 0)),
                pl.BlockSpec((1, D), lambda i, f: (0, 0)),
                pl.BlockSpec((D, tf), lambda i, f: (0, f)),
                pl.BlockSpec((1, tf), lambda i, f: (0, f)),
                pl.BlockSpec((tf, D), lambda i, f: (f, 0)),
                pl.BlockSpec((1, D), lambda i, f: (0, 0)),
            ],
            out_specs=pl.BlockSpec((tr, D), lambda i, f: (i, 0)),
            scratch_shapes=[pltpu.VMEM((tr, D), jnp.float32)],
        ),
        compiler_params=pltpu.CompilerParams(
            dimension_semantics=("parallel", "arbitrary"),
            vmem_limit_bytes=_VMEM_LIMIT,
        ),
    )(z1_2, gamma, beta, w1, b1, w2, b2)
    return out.reshape(orig_shape)


# ------------------------------------ Sublayers --------------------------------------
def sublayers_forward(x, mask, a_2, b_2, attn_params, ffn_params, n_heads):
    z1, weight = mha_block(x, mask, a_2, b_2, attn_params, n_heads)
    z2 = ffn_block(z1, a_2, b_2, ffn_params)
    return z2, weight


# --------------------------------- pure-JAX reference --------------------------------
def _reference_sublayers(x, mask, a_2, b_2, attn_params, ffn_params, n_heads):
    wq, bq, wk, bk, wv, bv, wo, bo = attn_params
    w1, b1, w2, b2 = ffn_params
    B, S, D = x.shape
    hd = D // n_heads

    def ln(t):
        mean = jnp.mean(t, axis=-1, keepdims=True)
        std = jnp.std(t, axis=-1, ddof=1, keepdims=True)
        return a_2 * (t - mean) / (std + EPS) + b_2

    xn = ln(x)

    def heads(w, b):
        return (xn @ w + b).reshape(B, S, n_heads, hd).transpose(0, 2, 1, 3)

    q, k, v = heads(wq, bq), heads(wk, bk), heads(wv, bv)
    scores = jnp.einsum("bhqd,bhkd->bhqk", q, k) / math.sqrt(hd)
    scores = jnp.where(mask[:, None, :, :] == 0, NEG_INF, scores)
    w = jax.nn.softmax(scores, axis=-1)
    v1 = jnp.einsum("bhqk,bhkd->bhqd", w, v)
    v2 = v1.transpose(0, 2, 1, 3).reshape(B, S, D)
    z = v2 @ wo + bo
    weight = jnp.sum(w, axis=1) / n_heads
    z1 = x + z
    z1n = ln(z1)
    hmid = jax.nn.relu(z1n @ w1 + b1)
    z2 = z1 + (hmid @ w2 + b2)
    return z2, weight


if __name__ == "__main__":
    key = jax.random.PRNGKey(0)
    batch, seq, d_model, n_heads, d_ff = 2, 8, 32, 4, 64

    keys = jax.random.split(key, 13)
    x = jax.random.normal(keys[0], (batch, seq, d_model), dtype=jnp.float32)
    # causal {0,1} float mask to exercise the masking path
    mask = jnp.broadcast_to(jnp.tril(jnp.ones((seq, seq), jnp.float32)), (batch, seq, seq))

    a_2 = jnp.ones((d_model,), jnp.float32)     # LayerNorm gamma (torch.ones(d))
    b_2 = jnp.zeros((d_model,), jnp.float32)    # LayerNorm beta  (torch.zeros(d))

    def init(k, shape, scale=0.1):
        return scale * jax.random.normal(k, shape, jnp.float32)

    attn_params = (
        init(keys[1], (d_model, d_model)), init(keys[2], (1, d_model)),   # W_q, b_q
        init(keys[3], (d_model, d_model)), init(keys[4], (1, d_model)),   # W_k, b_k
        init(keys[5], (d_model, d_model)), init(keys[6], (1, d_model)),   # W_v, b_v
        init(keys[7], (d_model, d_model)), init(keys[8], (1, d_model)),   # W_o, b_o
    )
    ffn_params = (
        init(keys[9], (d_model, d_ff)), init(keys[10], (1, d_ff)),        # W_1, b_1
        init(keys[11], (d_ff, d_model)), init(keys[12], (1, d_model)),    # W_2, b_2
    )

    z2, weight = sublayers_forward(x, mask, a_2, b_2, attn_params, ffn_params, n_heads)
    z2 = jax.block_until_ready(z2)
    weight = jax.block_until_ready(weight)

    z2_ref, weight_ref = _reference_sublayers(x, mask, a_2, b_2, attn_params, ffn_params, n_heads)
    assert z2.shape == (batch, seq, d_model) and weight.shape == (batch, seq, seq)
    # 2e-3 tolerance accounts for the EUP approx reciprocal in the softmax denominator.
    assert jnp.allclose(z2, z2_ref, atol=2e-3, rtol=2e-3), "Z2 mismatch vs reference"
    assert jnp.allclose(weight, weight_ref, atol=2e-3, rtol=2e-3), "attention weight mismatch"

    print("KERNEL_OK")
</pallas_src>

<mosaic_0001>
module attributes {stable_mosaic.version = 11 : i64} {
  func.func @_mha_kernel(%arg0: i32, %arg1: i32, %arg2: memref<1x8x32xf32, #tpu.memory_space<vmem>>, %arg3: memref<1x8x32xf32, #tpu.memory_space<vmem>>, %arg4: memref<1x8x8xf32, #tpu.memory_space<vmem>>, %arg5: memref<1x32xf32, #tpu.memory_space<vmem>>, %arg6: memref<1x32xf32, #tpu.memory_space<vmem>>, %arg7: memref<32x32xf32, #tpu.memory_space<vmem>>, %arg8: memref<1x32xf32, #tpu.memory_space<vmem>>, %arg9: memref<32x32xf32, #tpu.memory_space<vmem>>, %arg10: memref<1x32xf32, #tpu.memory_space<vmem>>, %arg11: memref<32x32xf32, #tpu.memory_space<vmem>>, %arg12: memref<1x32xf32, #tpu.memory_space<vmem>>, %arg13: memref<32x32xf32, #tpu.memory_space<vmem>>, %arg14: memref<1x32xf32, #tpu.memory_space<vmem>>, %arg15: memref<1x8x32xf32, #tpu.memory_space<vmem>>, %arg16: memref<1x8x8xf32, #tpu.memory_space<vmem>>) attributes {dimension_semantics = [#tpu.dimension_semantics<parallel>, #tpu.dimension_semantics<parallel>], iteration_bounds = array<i64: 2, 1>, scalar_prefetch = 0 : i64, scratch_operands = 0 : i64, tpu.core_type = #tpu.core_type<tc>, window_params = [{transform_indices = @transform_0, window_bounds = array<i64: 1, 8, 32>}, {transform_indices = @transform_1, window_bounds = array<i64: 1, 8, 32>}, {transform_indices = @transform_2, window_bounds = array<i64: 1, 8, 8>}, {pipeline_mode = #tpu.pipeline_mode<synchronous>, transform_indices = @transform_3, window_bounds = array<i64: 1, 32>}, {pipeline_mode = #tpu.pipeline_mode<synchronous>, transform_indices = @transform_4, window_bounds = array<i64: 1, 32>}, {pipeline_mode = #tpu.pipeline_mode<synchronous>, transform_indices = @transform_5, window_bounds = array<i64: 32, 32>}, {pipeline_mode = #tpu.pipeline_mode<synchronous>, transform_indices = @transform_6, window_bounds = array<i64: 1, 32>}, {pipeline_mode = #tpu.pipeline_mode<synchronous>, transform_indices = @transform_7, window_bounds = array<i64: 32, 32>}, {pipeline_mode = #tpu.pipeline_mode<synchronous>, transform_indices = @transform_8, window_bounds = array<i64: 1, 32>}, {pipeline_mode = #tpu.pipeline_mode<synchronous>, transform_indices = @transform_9, window_bounds = array<i64: 32, 32>}, {pipeline_mode = #tpu.pipeline_mode<synchronous>, transform_indices = @transform_10, window_bounds = array<i64: 1, 32>}, {pipeline_mode = #tpu.pipeline_mode<synchronous>, transform_indices = @transform_11, window_bounds = array<i64: 32, 32>}, {pipeline_mode = #tpu.pipeline_mode<synchronous>, transform_indices = @transform_12, window_bounds = array<i64: 1, 32>}, {transform_indices = @transform_13, window_bounds = array<i64: 1, 8, 32>}, {transform_indices = @transform_14, window_bounds = array<i64: 1, 8, 8>}]} {
    %c0 = arith.constant 0 : index
    %c0_0 = arith.constant 0 : index
    %c0_1 = arith.constant 0 : index
    %0 = vector.load %arg2[%c0, %c0_0, %c0_1] : memref<1x8x32xf32, #tpu.memory_space<vmem>>, vector<1x8x32xf32>
    %1 = vector.shape_cast %0 : vector<1x8x32xf32> to vector<8x32xf32>
    %c0_2 = arith.constant 0 : index
    %c0_3 = arith.constant 0 : index
    %c0_4 = arith.constant 0 : index
    %2 = vector.load %arg3[%c0_2, %c0_3, %c0_4] : memref<1x8x32xf32, #tpu.memory_space<vmem>>, vector<1x8x32xf32>
    %3 = vector.shape_cast %2 : vector<1x8x32xf32> to vector<8x32xf32>
    %c0_5 = arith.constant 0 : index
    %c0_6 = arith.constant 0 : index
    %4 = vector.load %arg5[%c0_5, %c0_6] : memref<1x32xf32, #tpu.memory_space<vmem>>, vector<1x32xf32>
    %c0_7 = arith.constant 0 : index
    %c0_8 = arith.constant 0 : index
    %5 = vector.load %arg6[%c0_7, %c0_8] : memref<1x32xf32, #tpu.memory_space<vmem>>, vector<1x32xf32>
    %cst = arith.constant dense<0.000000e+00> : vector<8xf32>
    %6 = vector.multi_reduction <add>, %1, %cst [1] : vector<8x32xf32> to vector<8xf32>
    %7 = vector.shape_cast %6 : vector<8xf32> to vector<8x1xf32>
    %cst_9 = arith.constant 3.200000e+01 : f32
    %8 = vector.broadcast %cst_9 : f32 to vector<8x1xf32>
    %9 = arith.divf %7, %8 : vector<8x1xf32>
    %10 = vector.broadcast %9 : vector<8x1xf32> to vector<8x32xf32>
    %11 = arith.subf %1, %10 : vector<8x32xf32>
    %12 = arith.mulf %11, %11 : vector<8x32xf32>
    %cst_10 = arith.constant dense<0.000000e+00> : vector<8xf32>
    %13 = vector.multi_reduction <add>, %12, %cst_10 [1] : vector<8x32xf32> to vector<8xf32>
    %14 = vector.shape_cast %13 : vector<8xf32> to vector<8x1xf32>
    %cst_11 = arith.constant 0.0322580636 : f32
    %15 = vector.broadcast %cst_11 : f32 to vector<8x1xf32>
    %16 = arith.mulf %14, %15 : vector<8x1xf32>
    %17 = math.sqrt %16 : vector<8x1xf32>
    %cst_12 = arith.constant 9.99999997E-7 : f32
    %18 = vector.broadcast %cst_12 : f32 to vector<8x1xf32>
    %19 = arith.addf %17, %18 : vector<8x1xf32>
    %20 = tpu.reciprocal %19 : vector<8x1xf32> -> vector<8x1xf32>
    %21 = vector.broadcast %4 : vector<1x32xf32> to vector<8x32xf32>
    %22 = vector.broadcast %20 : vector<8x1xf32> to vector<8x32xf32>
    %23 = arith.mulf %21, %22 : vector<8x32xf32>
    %24 = arith.mulf %11, %23 : vector<8x32xf32>
    %25 = vector.broadcast %5 : vector<1x32xf32> to vector<8x32xf32>
    %26 = arith.addf %24, %25 : vector<8x32xf32>
    %cst_13 = arith.constant dense<0.000000e+00> : vector<8xf32>
    %27 = vector.multi_reduction <add>, %3, %cst_13 [1] : vector<8x32xf32> to vector<8xf32>
    %28 = vector.shape_cast %27 : vector<8xf32> to vector<8x1xf32>
    %cst_14 = arith.constant 3.200000e+01 : f32
    %29 = vector.broadcast %cst_14 : f32 to vector<8x1xf32>
    %30 = arith.divf %28, %29 : vector<8x1xf32>
    %31 = vector.broadcast %30 : vector<8x1xf32> to vector<8x32xf32>
    %32 = arith.subf %3, %31 : vector<8x32xf32>
    %33 = arith.mulf %32, %32 : vector<8x32xf32>
    %cst_15 = arith.constant dense<0.000000e+00> : vector<8xf32>
    %34 = vector.multi_reduction <add>, %33, %cst_15 [1] : vector<8x32xf32> to vector<8xf32>
    %35 = vector.shape_cast %34 : vector<8xf32> to vector<8x1xf32>
    %cst_16 = arith.constant 0.0322580636 : f32
    %36 = vector.broadcast %cst_16 : f32 to vector<8x1xf32>
    %37 = arith.mulf %35, %36 : vector<8x1xf32>
    %38 = math.sqrt %37 : vector<8x1xf32>
    %cst_17 = arith.constant 9.99999997E-7 : f32
    %39 = vector.broadcast %cst_17 : f32 to vector<8x1xf32>
    %40 = arith.addf %38, %39 : vector<8x1xf32>
    %41 = tpu.reciprocal %40 : vector<8x1xf32> -> vector<8x1xf32>
    %42 = vector.broadcast %4 : vector<1x32xf32> to vector<8x32xf32>
    %43 = vector.broadcast %41 : vector<8x1xf32> to vector<8x32xf32>
    %44 = arith.mulf %42, %43 : vector<8x32xf32>
    %45 = arith.mulf %32, %44 : vector<8x32xf32>
    %46 = vector.broadcast %5 : vector<1x32xf32> to vector<8x32xf32>
    %47 = arith.addf %45, %46 : vector<8x32xf32>
    %c0_18 = arith.constant 0 : index
    %c0_19 = arith.constant 0 : index
    %48 = vector.load %arg7[%c0_18, %c0_19] : memref<32x32xf32, #tpu.memory_space<vmem>>, vector<32x32xf32>
    %cst_20 = arith.constant dense<0.000000e+00> : vector<8x32xf32>
    %49 = tpu.matmul %26, %48, %cst_20 {dimension_numbers = #tpu.dot_dimension_numbers<[1], [0], [0], [1], [0, 0, 1, 1], [], []>} : vector<8x32xf32>, vector<32x32xf32>, vector<8x32xf32> -> vector<8x32xf32>
    %c0_21 = arith.constant 0 : index
    %c0_22 = arith.constant 0 : index
    %50 = vector.load %arg8[%c0_21, %c0_22] : memref<1x32xf32, #tpu.memory_space<vmem>>, vector<1x32xf32>
    %51 = vector.broadcast %50 : vector<1x32xf32> to vector<8x32xf32>
    %52 = arith.addf %49, %51 : vector<8x32xf32>
    %c0_23 = arith.constant 0 : index
    %c0_24 = arith.constant 0 : index
    %53 = vector.load %arg9[%c0_23, %c0_24] : memref<32x32xf32, #tpu.memory_space<vmem>>, vector<32x32xf32>
    %cst_25 = arith.constant dense<0.000000e+00> : vector<8x32xf32>
    %54 = tpu.matmul %47, %53, %cst_25 {dimension_numbers = #tpu.dot_dimension_numbers<[1], [0], [0], [1], [0, 0, 1, 1], [], []>} : vector<8x32xf32>, vector<32x32xf32>, vector<8x32xf32> -> vector<8x32xf32>
    %c0_26 = arith.constant 0 : index
    %c0_27 = arith.constant 0 : index
    %55 = vector.load %arg10[%c0_26, %c0_27] : memref<1x32xf32, #tpu.memory_space<vmem>>, vector<1x32xf32>
    %56 = vector.broadcast %55 : vector<1x32xf32> to vector<8x32xf32>
    %57 = arith.addf %54, %56 : vector<8x32xf32>
    %c0_28 = arith.constant 0 : index
    %c0_29 = arith.constant 0 : index
    %58 = vector.load %arg11[%c0_28, %c0_29] : memref<32x32xf32, #tpu.memory_space<vmem>>, vector<32x32xf32>
    %cst_30 = arith.constant dense<0.000000e+00> : vector<8x32xf32>
    %59 = tpu.matmul %47, %58, %cst_30 {dimension_numbers = #tpu.dot_dimension_numbers<[1], [0], [0], [1], [0, 0, 1, 1], [], []>} : vector<8x32xf32>, vector<32x32xf32>, vector<8x32xf32> -> vector<8x32xf32>
    %c0_31 = arith.constant 0 : index
    %c0_32 = arith.constant 0 : index
    %60 = vector.load %arg12[%c0_31, %c0_32] : memref<1x32xf32, #tpu.memory_space<vmem>>, vector<1x32xf32>
    %61 = vector.broadcast %60 : vector<1x32xf32> to vector<8x32xf32>
    %62 = arith.addf %59, %61 : vector<8x32xf32>
    %c0_33 = arith.constant 0 : index
    %c0_34 = arith.constant 0 : index
    %c0_35 = arith.constant 0 : index
    %63 = vector.load %arg4[%c0_33, %c0_34, %c0_35] : memref<1x8x8xf32, #tpu.memory_space<vmem>>, vector<1x8x8xf32>
    %64 = vector.shape_cast %63 : vector<1x8x8xf32> to vector<8x8xf32>
    %cst_36 = arith.constant 0.000000e+00 : f32
    %65 = vector.broadcast %cst_36 : f32 to vector<8x8xf32>
    %66 = arith.cmpf oeq, %64, %65 : vector<8x8xf32>
    %cst_37 = arith.constant -1.000000e+09 : f32
    %cst_38 = arith.constant 0.000000e+00 : f32
    %67 = vector.broadcast %cst_37 : f32 to vector<8x8xf32>
    %68 = vector.broadcast %cst_38 : f32 to vector<8x8xf32>
    %69 = arith.select %66, %67, %68 : vector<8x8xi1>, vector<8x8xf32>
    %cst_39 = arith.constant 0.000000e+00 : f32
    %70 = vector.broadcast %cst_39 : f32 to vector<8x8xf32>
    %71 = vector.extract_strided_slice %52 {offsets = [0, 0], sizes = [8, 8], strides = [1, 1]} : vector<8x32xf32> to vector<8x8xf32>
    %72 = vector.extract_strided_slice %57 {offsets = [0, 0], sizes = [8, 8], strides = [1, 1]} : vector<8x32xf32> to vector<8x8xf32>
    %73 = vector.extract_strided_slice %62 {offsets = [0, 0], sizes = [8, 8], strides = [1, 1]} : vector<8x32xf32> to vector<8x8xf32>
    %cst_40 = arith.constant dense<0.000000e+00> : vector<8x8xf32>
    %74 = tpu.matmul %71, %72, %cst_40 {dimension_numbers = #tpu.dot_dimension_numbers<[1], [1], [0], [0], [0, 0, 1, 0], [], []>} : vector<8x8xf32>, vector<8x8xf32>, vector<8x8xf32> -> vector<8x8xf32>
    %75 = arith.addf %74, %69 : vector<8x8xf32>
    %cst_41 = arith.constant dense<0xFF800000> : vector<8xf32>
    %76 = vector.multi_reduction <maximumf>, %75, %cst_41 [1] : vector<8x8xf32> to vector<8xf32>
    %77 = vector.shape_cast %76 : vector<8xf32> to vector<8x1xf32>
    %78 = vector.broadcast %77 : vector<8x1xf32> to vector<8x8xf32>
    %79 = arith.subf %75, %78 : vector<8x8xf32>
    %80 = math.exp %79 : vector<8x8xf32>
    %cst_42 = arith.constant dense<0.000000e+00> : vector<8xf32>
    %81 = vector.multi_reduction <add>, %80, %cst_42 [1] : vector<8x8xf32> to vector<8xf32>
    %82 = vector.shape_cast %81 : vector<8xf32> to vector<8x1xf32>
    %83 = tpu.reciprocal %82 {approx = true} : vector<8x1xf32> -> vector<8x1xf32>
    %84 = vector.broadcast %83 : vector<8x1xf32> to vector<8x8xf32>
    %85 = arith.mulf %80, %84 : vector<8x8xf32>
    %86 = arith.addf %70, %85 : vector<8x8xf32>
    %cst_43 = arith.constant dense<0.000000e+00> : vector<8x8xf32>
    %87 = tpu.matmul %85, %73, %cst_43 {dimension_numbers = #tpu.dot_dimension_numbers<[1], [0], [0], [1], [0, 0, 1, 1], [], []>} : vector<8x8xf32>, vector<8x8xf32>, vector<8x8xf32> -> vector<8x8xf32>
    %88 = vector.extract_strided_slice %52 {offsets = [0, 8], sizes = [8, 8], strides = [1, 1]} : vector<8x32xf32> to vector<8x8xf32>
    %89 = vector.extract_strided_slice %57 {offsets = [0, 8], sizes = [8, 8], strides = [1, 1]} : vector<8x32xf32> to vector<8x8xf32>
    %90 = vector.extract_strided_slice %62 {offsets = [0, 8], sizes = [8, 8], strides = [1, 1]} : vector<8x32xf32> to vector<8x8xf32>
    %cst_44 = arith.constant dense<0.000000e+00> : vector<8x8xf32>
    %91 = tpu.matmul %88, %89, %cst_44 {dimension_numbers = #tpu.dot_dimension_numbers<[1], [1], [0], [0], [0, 0, 1, 0], [], []>} : vector<8x8xf32>, vector<8x8xf32>, vector<8x8xf32> -> vector<8x8xf32>
    %92 = arith.addf %91, %69 : vector<8x8xf32>
    %cst_45 = arith.constant dense<0xFF800000> : vector<8xf32>
    %93 = vector.multi_reduction <maximumf>, %92, %cst_45 [1] : vector<8x8xf32> to vector<8xf32>
    %94 = vector.shape_cast %93 : vector<8xf32> to vector<8x1xf32>
    %95 = vector.broadcast %94 : vector<8x1xf32> to vector<8x8xf32>
    %96 = arith.subf %92, %95 : vector<8x8xf32>
    %97 = math.exp %96 : vector<8x8xf32>
    %cst_46 = arith.constant dense<0.000000e+00> : vector<8xf32>
    %98 = vector.multi_reduction <add>, %97, %cst_46 [1] : vector<8x8xf32> to vector<8xf32>
    %99 = vector.shape_cast %98 : vector<8xf32> to vector<8x1xf32>
    %100 = tpu.reciprocal %99 {approx = true} : vector<8x1xf32> -> vector<8x1xf32>
    %101 = vector.broadcast %100 : vector<8x1xf32> to vector<8x8xf32>
    %102 = arith.mulf %97, %101 : vector<8x8xf32>
    %103 = arith.addf %86, %102 : vector<8x8xf32>
    %cst_47 = arith.constant dense<0.000000e+00> : vector<8x8xf32>
    %104 = tpu.matmul %102, %90, %cst_47 {dimension_numbers = #tpu.dot_dimension_numbers<[1], [0], [0], [1], [0, 0, 1, 1], [], []>} : vector<8x8xf32>, vector<8x8xf32>, vector<8x8xf32> -> vector<8x8xf32>
    %105 = vector.extract_strided_slice %52 {offsets = [0, 16], sizes = [8, 8], strides = [1, 1]} : vector<8x32xf32> to vector<8x8xf32>
    %106 = vector.extract_strided_slice %57 {offsets = [0, 16], sizes = [8, 8], strides = [1, 1]} : vector<8x32xf32> to vector<8x8xf32>
    %107 = vector.extract_strided_slice %62 {offsets = [0, 16], sizes = [8, 8], strides = [1, 1]} : vector<8x32xf32> to vector<8x8xf32>
    %cst_48 = arith.constant dense<0.000000e+00> : vector<8x8xf32>
    %108 = tpu.matmul %105, %106, %cst_48 {dimension_numbers = #tpu.dot_dimension_numbers<[1], [1], [0], [0], [0, 0, 1, 0], [], []>} : vector<8x8xf32>, vector<8x8xf32>, vector<8x8xf32> -> vector<8x8xf32>
    %109 = arith.addf %108, %69 : vector<8x8xf32>
    %cst_49 = arith.constant dense<0xFF800000> : vector<8xf32>
    %110 = vector.multi_reduction <maximumf>, %109, %cst_49 [1] : vector<8x8xf32> to vector<8xf32>
    %111 = vector.shape_cast %110 : vector<8xf32> to vector<8x1xf32>
    %112 = vector.broadcast %111 : vector<8x1xf32> to vector<8x8xf32>
    %113 = arith.subf %109, %112 : vector<8x8xf32>
    %114 = math.exp %113 : vector<8x8xf32>
    %cst_50 = arith.constant dense<0.000000e+00> : vector<8xf32>
    %115 = vector.multi_reduction <add>, %114, %cst_50 [1] : vector<8x8xf32> to vector<8xf32>
    %116 = vector.shape_cast %115 : vector<8xf32> to vector<8x1xf32>
    %117 = tpu.reciprocal %116 {approx = true} : vector<8x1xf32> -> vector<8x1xf32>
    %118 = vector.broadcast %117 : vector<8x1xf32> to vector<8x8xf32>
    %119 = arith.mulf %114, %118 : vector<8x8xf32>
    %120 = arith.addf %103, %119 : vector<8x8xf32>
    %cst_51 = arith.constant dense<0.000000e+00> : vector<8x8xf32>
    %121 = tpu.matmul %119, %107, %cst_51 {dimension_numbers = #tpu.dot_dimension_numbers<[1], [0], [0], [1], [0, 0, 1, 1], [], []>} : vector<8x8xf32>, vector<8x8xf32>, vector<8x8xf32> -> vector<8x8xf32>
    %122 = vector.extract_strided_slice %52 {offsets = [0, 24], sizes = [8, 8], strides = [1, 1]} : vector<8x32xf32> to vector<8x8xf32>
    %123 = vector.extract_strided_slice %57 {offsets = [0, 24], sizes = [8, 8], strides = [1, 1]} : vector<8x32xf32> to vector<8x8xf32>
    %124 = vector.extract_strided_slice %62 {offsets = [0, 24], sizes = [8, 8], strides = [1, 1]} : vector<8x32xf32> to vector<8x8xf32>
    %cst_52 = arith.constant dense<0.000000e+00> : vector<8x8xf32>
    %125 = tpu.matmul %122, %123, %cst_52 {dimension_numbers = #tpu.dot_dimension_numbers<[1], [1], [0], [0], [0, 0, 1, 0], [], []>} : vector<8x8xf32>, vector<8x8xf32>, vector<8x8xf32> -> vector<8x8xf32>
    %126 = arith.addf %125, %69 : vector<8x8xf32>
    %cst_53 = arith.constant dense<0xFF800000> : vector<8xf32>
    %127 = vector.multi_reduction <maximumf>, %126, %cst_53 [1] : vector<8x8xf32> to vector<8xf32>
    %128 = vector.shape_cast %127 : vector<8xf32> to vector<8x1xf32>
    %129 = vector.broadcast %128 : vector<8x1xf32> to vector<8x8xf32>
    %130 = arith.subf %126, %129 : vector<8x8xf32>
    %131 = math.exp %130 : vector<8x8xf32>
    %cst_54 = arith.constant dense<0.000000e+00> : vector<8xf32>
    %132 = vector.multi_reduction <add>, %131, %cst_54 [1] : vector<8x8xf32> to vector<8xf32>
    %133 = vector.shape_cast %132 : vector<8xf32> to vector<8x1xf32>
    %134 = tpu.reciprocal %133 {approx = true} : vector<8x1xf32> -> vector<8x1xf32>
    %135 = vector.broadcast %134 : vector<8x1xf32> to vector<8x8xf32>
    %136 = arith.mulf %131, %135 : vector<8x8xf32>
    %137 = arith.addf %120, %136 : vector<8x8xf32>
    %cst_55 = arith.constant dense<0.000000e+00> : vector<8x8xf32>
    %138 = tpu.matmul %136, %124, %cst_55 {dimension_numbers = #tpu.dot_dimension_numbers<[1], [0], [0], [1], [0, 0, 1, 1], [], []>} : vector<8x8xf32>, vector<8x8xf32>, vector<8x8xf32> -> vector<8x8xf32>
    %139 = tpu.concatenate %87, %104, %121, %138 in 1 : vector<8x8xf32>, vector<8x8xf32>, vector<8x8xf32>, vector<8x8xf32> -> vector<8x32xf32>
    %c0_56 = arith.constant 0 : index
    %c0_57 = arith.constant 0 : index
    %140 = vector.load %arg13[%c0_56, %c0_57] : memref<32x32xf32, #tpu.memory_space<vmem>>, vector<32x32xf32>
    %cst_58 = arith.constant dense<0.000000e+00> : vector<8x32xf32>
    %141 = tpu.matmul %139, %140, %cst_58 {dimension_numbers = #tpu.dot_dimension_numbers<[1], [0], [0], [1], [0, 0, 1, 1], [], []>} : vector<8x32xf32>, vector<32x32xf32>, vector<8x32xf32> -> vector<8x32xf32>
    %c0_59 = arith.constant 0 : index
    %c0_60 = arith.constant 0 : index
    %142 = vector.load %arg14[%c0_59, %c0_60] : memref<1x32xf32, #tpu.memory_space<vmem>>, vector<1x32xf32>
    %143 = vector.broadcast %142 : vector<1x32xf32> to vector<8x32xf32>
    %144 = arith.addf %141, %143 : vector<8x32xf32>
    %145 = arith.addf %1, %144 : vector<8x32xf32>
    %c0_61 = arith.constant 0 : index
    %c0_62 = arith.constant 0 : index
    %c0_63 = arith.constant 0 : index
    %146 = vector.load %arg15[%c0_61, %c0_62, %c0_63] : memref<1x8x32xf32, #tpu.memory_space<vmem>>, vector<1x8x32xf32>
    %147 = vector.shape_cast %146 : vector<1x8x32xf32> to vector<8x32xf32>
    %148 = vector.shape_cast %145 : vector<8x32xf32> to vector<1x8x32xf32>
    tpu.vector_store %arg15[%c0_61, %c0_62, %c0_63], %148 {strides = array<i32>} : memref<1x8x32xf32, #tpu.memory_space<vmem>>, vector<1x8x32xf32>,
    %cst_64 = arith.constant 2.500000e-01 : f32
    %149 = vector.broadcast %cst_64 : f32 to vector<8x8xf32>
    %150 = arith.mulf %137, %149 : vector<8x8xf32>
    %c0_65 = arith.constant 0 : index
    %c0_66 = arith.constant 0 : index
    %c0_67 = arith.constant 0 : index
    %151 = vector.load %arg16[%c0_65, %c0_66, %c0_67] : memref<1x8x8xf32, #tpu.memory_space<vmem>>, vector<1x8x8xf32>
    %152 = vector.shape_cast %151 : vector<1x8x8xf32> to vector<8x8xf32>
    %153 = vector.shape_cast %150 : vector<8x8xf32> to vector<1x8x8xf32>
    tpu.vector_store %arg16[%c0_65, %c0_66, %c0_67], %153 {strides = array<i32>} : memref<1x8x8xf32, #tpu.memory_space<vmem>>, vector<1x8x8xf32>,
    return
  }
  func.func @transform_0(%arg0: i32, %arg1: i32) -> (i32, i32, i32) {
    %c0_i32 = arith.constant 0 : i32
    %c0_i32_0 = arith.constant 0 : i32
    return %arg0, %arg1, %c0_i32 : i32, i32, i32
  }
  func.func @transform_1(%arg0: i32, %arg1: i32) -> (i32, i32, i32) {
    %c0_i32 = arith.constant 0 : i32
    %c0_i32_0 = arith.constant 0 : i32
    %c0_i32_1 = arith.constant 0 : i32
    return %arg0, %c0_i32, %c0_i32_0 : i32, i32, i32
  }
  func.func @transform_2(%arg0: i32, %arg1: i32) -> (i32, i32, i32) {
    %c0_i32 = arith.constant 0 : i32
    %c0_i32_0 = arith.constant 0 : i32
    return %arg0, %arg1, %c0_i32 : i32, i32, i32
  }
  func.func @transform_3(%arg0: i32, %arg1: i32) -> (i32, i32) {
    %c0_i32 = arith.constant 0 : i32
    %c0_i32_0 = arith.constant 0 : i32
    %c0_i32_1 = arith.constant 0 : i32
    return %c0_i32, %c0_i32_0 : i32, i32
  }
  func.func @transform_4(%arg0: i32, %arg1: i32) -> (i32, i32) {
    %c0_i32 = arith.constant 0 : i32
    %c0_i32_0 = arith.constant 0 : i32
    %c0_i32_1 = arith.constant 0 : i32
    return %c0_i32, %c0_i32_0 : i32, i32
  }
  func.func @transform_5(%arg0: i32, %arg1: i32) -> (i32, i32) {
    %c0_i32 = arith.constant 0 : i32
    %c0_i32_0 = arith.constant 0 : i32
    %c0_i32_1 = arith.constant 0 : i32
    return %c0_i32, %c0_i32_0 : i32, i32
  }
  func.func @transform_6(%arg0: i32, %arg1: i32) -> (i32, i32) {
    %c0_i32 = arith.constant 0 : i32
    %c0_i32_0 = arith.constant 0 : i32
    %c0_i32_1 = arith.constant 0 : i32
    return %c0_i32, %c0_i32_0 : i32, i32
  }
  func.func @transform_7(%arg0: i32, %arg1: i32) -> (i32, i32) {
    %c0_i32 = arith.constant 0 : i32
    %c0_i32_0 = arith.constant 0 : i32
    %c0_i32_1 = arith.constant 0 : i32
    return %c0_i32, %c0_i32_0 : i32, i32
  }
  func.func @transform_8(%arg0: i32, %arg1: i32) -> (i32, i32) {
    %c0_i32 = arith.constant 0 : i32
    %c0_i32_0 = arith.constant 0 : i32
    %c0_i32_1 = arith.constant 0 : i32
    return %c0_i32, %c0_i32_0 : i32, i32
  }
  func.func @transform_9(%arg0: i32, %arg1: i32) -> (i32, i32) {
    %c0_i32 = arith.constant 0 : i32
    %c0_i32_0 = arith.constant 0 : i32
    %c0_i32_1 = arith.constant 0 : i32
    return %c0_i32, %c0_i32_0 : i32, i32
  }
  func.func @transform_10(%arg0: i32, %arg1: i32) -> (i32, i32) {
    %c0_i32 = arith.constant 0 : i32
    %c0_i32_0 = arith.constant 0 : i32
    %c0_i32_1 = arith.constant 0 : i32
    return %c0_i32, %c0_i32_0 : i32, i32
  }
  func.func @transform_11(%arg0: i32, %arg1: i32) -> (i32, i32) {
    %c0_i32 = arith.constant 0 : i32
    %c0_i32_0 = arith.constant 0 : i32
    %c0_i32_1 = arith.constant 0 : i32
    return %c0_i32, %c0_i32_0 : i32, i32
  }
  func.func @transform_12(%arg0: i32, %arg1: i32) -> (i32, i32) {
    %c0_i32 = arith.constant 0 : i32
    %c0_i32_0 = arith.constant 0 : i32
    %c0_i32_1 = arith.constant 0 : i32
    return %c0_i32, %c0_i32_0 : i32, i32
  }
  func.func @transform_13(%arg0: i32, %arg1: i32) -> (i32, i32, i32) {
    %c0_i32 = arith.constant 0 : i32
    %c0_i32_0 = arith.constant 0 : i32
    return %arg0, %arg1, %c0_i32 : i32, i32, i32
  }
  func.func @transform_14(%arg0: i32, %arg1: i32) -> (i32, i32, i32) {
    %c0_i32 = arith.constant 0 : i32
    %c0_i32_0 = arith.constant 0 : i32
    return %arg0, %arg1, %c0_i32 : i32, i32, i32
  }
}

</mosaic_0001>

<bundles_post_ra>
// kernel: tpu_custom_call.1
= control target key start
LH: loop header
LB: loop body
LE: loop exit
PB: predicated region body
PF: predicated region fallthrough
CT: control target
= control target key end

     0   :  { %s2351_s0 = inlined_call_operand.hbm [shape: f32[2,8,32], index: 0, kind: input, shape index: {}]   ;;  %s2352_s1 = inlined_call_operand.hbm [shape: f32[2,8,32], index: 1, kind: input, shape index: {}]   ;;  %s2353_s2 = inlined_call_operand.hbm [shape: f32[2,8,8], index: 2, kind: input, shape index: {}]   ;;  %s2354_s3 = inlined_call_operand.vmem [shape: f32[1,32], index: 3, kind: input, shape index: {}]   ;;  %s2355_s4 = inlined_call_operand.vmem [shape: f32[1,32], index: 4, kind: input, shape index: {}]   ;;  %s2356_s5 = inlined_call_operand.hbm [shape: f32[32,32], index: 5, kind: input, shape index: {}]   ;;  %s2357_s6 = inlined_call_operand.vmem [shape: f32[1,32], index: 6, kind: input, shape index: {}]   ;;  %s2358_s7 = inlined_call_operand.hbm [shape: f32[32,32], index: 7, kind: input, shape index: {}]   ;;  %s2359_s8 = inlined_call_operand.vmem [shape: f32[1,32], index: 8, kind: input, shape index: {}]   ;;  %s2360_s9 = inlined_call_operand.hbm [shape: f32[32,32], index: 9, kind: input, shape index: {}]   ;;  %s2361_s10 = inlined_call_operand.vmem [shape: f32[1,32], index: 10, kind: input, shape index: {}]   ;;  %s2362_s11 = inlined_call_operand.hbm [shape: f32[32,32], index: 11, kind: input, shape index: {}]   ;;  %s2363_s12 = inlined_call_operand.vmem [shape: f32[1,32], index: 12, kind: input, shape index: {}]   ;;  %s2364_s13 = inlined_call_operand.hbm [shape: f32[2,8,32], index: 13, kind: output, shape index: {0}]   ;;  %s2365_s14 = inlined_call_operand.hbm [shape: f32[2,8,8], index: 14, kind: output, shape index: {1}]  }
   0x1   :  { %2381 = sst [smem:[#allocation31_spill]] %s2351_s0 }
   0x2   :  { %2382 = sst [smem:[#allocation32_spill]] %s2352_s1 }
   0x3   :  { %2383 = sst [smem:[#allocation33_spill]] %s2356_s5 }
   0x4   :  { %2384 = sst [smem:[#allocation34_spill]] %s2358_s7 }
   0x5   :  { %2385 = sst [smem:[#allocation35_spill]] %s2360_s9 }
   0x6   :  { %2386 = sst [smem:[#allocation36_spill]] %s2362_s11 }
   0x7   :  { %2387 = sst [smem:[#allocation37_spill]] %s2363_s12 }
   0x8   :  { %2388 = sst [smem:[#allocation38_spill]] %s2364_s13 }
   0x9   :  { %2389 = sst [smem:[#allocation39_spill]] %s2365_s14 }
   0xa   :  { %20 = vsyncpa [#allocation3], 0 }
   0xb   :  { %22 = vsyncpa [#allocation3 + $0x1], 0 }
   0xc   :  { %23 = vsyncpa [#allocation6], 0 }
   0xd   :  { %25 = vsyncpa [#allocation6 + $0x1], 0 }
   0xe   :  { %26 = vsyncpa [#allocation9], 0 }
   0xf   :  { %27 = vsyncpa [#allocation12], 0 }
  0x10   :  { %28 = vsyncpa [#allocation4], 0 }
  0x11   :  { %30 = vsyncpa [#allocation4 + $0x1], 0 }
  0x12   :  { %31 = vsyncpa [#allocation16], 0 }
  0x13   :  { %33 = vsyncpa [#allocation16 + $0x1], 0  ;;  %s2029_s29 = smov 0   ;;  %s2031_s30 = smov 0  }
  0x14   :  { %s2033_s15 = smov 0   ;;  %s2035_s16 = smov 0  }
  0x15   :  { %s2037_s17 = smov 0   ;;  %s2039_s18 = smov 0  }
  0x16 LB: > { %2390 = sst [smem:[#allocation23_spill]] %s1918_s29  ;;  %s2060_s19 = sadd.s32 4294967295, %s1938_s18   ;;  %s1938_s18 = sphi %s2039_s18, %s39_s18   ;;  %s1934_s17 = sphi %s2037_s17, %s2424_s17   ;;  %s1930_s16 = sphi %s2035_s16, %s2423_s16   ;;  %s1926_s15 = sphi %s2033_s15, %s2427_s15   ;;  %s1922_s30 = sphi %s2031_s30, %s2426_s30   ;;  %s1918_s29 = sphi %s2029_s29, %s2425_s29  }
  0x17   : > { %2391 = sst [smem:[#allocation24_spill]] %s1930_s16  ;;  %p1398_p0 = scmp.ge.s32.totalorder %s1938_s18, 1 }
  0x18   : > { %2392 = sst [smem:[#allocation25_spill]] %s1934_s17  ;;  %p74_p1 = scmp.eq.s32.totalorder %s2060_s19, 0 }
  0x19   : > { %2393 = sst [smem:[#allocation26_spill]] %s1938_s18  ;;  %p404_p2 = scmp.lt.s32.totalorder %s1938_s18, 3 }
  0x1a   : > { %s2394_s5 = sld [smem:[#allocation33_spill]]  ;;  %s1940_s24 = smov [#allocation8]  }
  0x1b   : > { %p2068_p3 = pnand %p1398_p0, %p404_p2  ;;  %s423_s25 = sshll.u32 %s1940_s24, 4  ;;  %s424_s25 = int_to_ptr.vmem [resolvable:$true] %s423_s25 }
  0x1c   : > { %p1403_p6 = scmp.ge.s32.totalorder %s1938_s18, 2  ;;  %s2397_s9 = sld [smem:[#allocation35_spill]] }
  0x1d   : > { %p1468_p4 = pneg %p2068_p3  ;;  %s2367_s21 = smov 128  }
  0x1e   : > { %s2369_s24 = smov 8   ;;  %s1397_s27 = sadd.s32 4294967294, %s1938_s18  }
  0x1f   : > { %p2076_p5 = pnand %p1468_p4, %p74_p1  ;;  %s51_s28 = sadd.s32 1, %s1934_s17 }
  0x20   : > { %s421_s22 = sshll.u32 %s2394_s5, 4  ;;  %s1943_s5 = smov [#allocation11]   ;;  %s422_s22 = int_to_ptr.hbm [resolvable:$true] %s421_s22 }
  0x21   : > { %1471 = dma.hbm_to_vmem [thread:$0]  (!%p2076_p5), %s422_s22, 512, %s424_s25, [#allocation9], %s2367_s21, %s2367_s21, %s2369_s24  }
  0x22   : > { %s455_s20 = sshll.u32 %s2397_s9, 4  ;;  %s457_s13 = sshll.u32 %s1943_s5, 4  ;;  %s456_s20 = int_to_ptr.hbm [resolvable:$true] %s455_s20  ;;  %s458_s13 = int_to_ptr.vmem [resolvable:$true] %s457_s13 }
  0x23   : > { %1477 = dma.hbm_to_vmem [thread:$0]  (!%p2076_p5), %s456_s20, 512, %s458_s13, [#allocation12], %s2367_s21, %s2367_s21, %s2369_s24  }
  0x24   : > { %p53_p7 = scmp.ge.s32.totalorder %s51_s28, 2  ;;  %s60_s9 = sadd.s32 1, %s1926_s15 }
  0x25   : > { %p67_p8 = scmp.ne.s32.totalorder %s1926_s15, %s1922_s30  ;;  %p68_p9 = scmp.eq.s32.totalorder %s1938_s18, 0 }
  0x26   : > { %s2429_s28 = smov (%p53_p7, %s51_s28), 0  ;;  %p73_p11 = scmp.ne.s32.totalorder %s1922_s30, %s1918_s29 }
  0x27   : > { %2398 = sst [smem:[#allocation27_spill]] %s2429_s28  ;;  %p2102_p10 = por %p68_p9, %p67_p8 }
  0x28   : > { %s55_s13 = ssub.s32 %s1934_s17, %s2429_s28  ;;  %p363_p12 = scmp.eq.s32.totalorder %s2060_s19, 1 }
  0x29   : > { %p58_p13 = scmp.eq.s32.totalorder %s55_s13, 0  ;;  %p2113_p0 = por %p74_p1, %p73_p11 }
  0x2a   : > { %p2117_p2 = por %p363_p12, %p67_p8  ;;  %p369_p4 = scmp.eq.s32.totalorder %s1397_s27, 1 }
  0x2b   : > { %s2122_s20 = scalar_select %p58_p13, %s1926_s15, %s60_s9  }
  0x2c   : > { %s2401_s25 = scalar_select %p2117_p2, 1, 0 }
  0x2d   : > { %2403 = sst [smem:[#allocation29_spill]] %s2122_s20  ;;  %p2124_p7 = por %p369_p4, %p73_p11 }
  0x2e   : > { %2402 = sst [smem:[#allocation28_spill]] %s2401_s25  ;;  %p1502_p9 = scmp.lt.s32.totalorder %s1938_s18, 2 }
  0x2f   : > { %s2404_s21 = scalar_select %p2124_p7, 1, 0 }
  0x30   : > { %s2376_s24 = sand.u32 1, %s1926_s15   ;;  %s2131_s28 = sshll.u32 %s1934_s17, 3 }
  0x31   : > { %2405 = sst [smem:[#allocation30_spill]] %s2404_s21  ;;  %s2135_s13 = sshll.u32 %s2376_s24, 3 }
  0x32   : > { %p2139_p8 = pnand %p1502_p9, %p2102_p10  ;;  %s511_s9 = sand.u32 1, %s1938_s18  }
  0x33   : > { %s2407_s1 = sld [smem:[#allocation32_spill]]  ;;  %s515_s12 = scalar_lea.vmem [#allocation5], %s2135_s13 }
  0x34   : > { %s523_s17 = sshll.u32 %s515_s12, 4  ;;  %s2408_s7 = sld [smem:[#allocation34_spill]]  ;;  %s524_s17 = int_to_ptr.vmem [resolvable:$true] %s523_s17 }
  0x35   : > { %s512_s16 = scalar_lea.sflag [#allocation6], %s511_s9  ;;  %s1944_s18 = smov [#allocation10]  }
  0x36   : > { %s440_s20 = sshll.u32 %s1944_s18, 4  ;;  %s2409_s11 = sld [smem:[#allocation36_spill]]  ;;  %s441_s20 = int_to_ptr.vmem [resolvable:$true] %s440_s20 }
  0x37   : > { %s2411_s24 = smov 128   ;;  %s1945_s9 = smov [#allocation13]  }
  0x38   : > { %s2412_s0 = sld [smem:[#allocation31_spill]]  ;;  %s495_s27 = scalar_lea.vmem [#allocation2], %s2135_s13 }
  0x39   : > { %s519_s21 = scalar_lea.hbm %s2407_s1, %s2131_s28 }
  0x3a   : > { %s521_s14 = sshll.u32 %s519_s21, 4  ;;  %s438_s25 = sshll.u32 %s2408_s7, 4  ;;  %s522_s14 = int_to_ptr.hbm [resolvable:$true] %s521_s14  ;;  %s439_s25 = int_to_ptr.hbm [resolvable:$true] %s438_s25 }
  0x3b   : > { %1487 = dma.hbm_to_vmem [thread:$0]  (!%p2139_p8), %s522_s14, 128, %s524_s17, %s512_s16  }
  0x3c   : > { %s472_s12 = sshll.u32 %s2409_s11, 4  ;;  %s2410_s21 = smov 8   ;;  %s473_s12 = int_to_ptr.hbm [resolvable:$true] %s472_s12 }
  0x3d   : > { %1474 = dma.hbm_to_vmem [thread:$0]  (!%p2076_p5), %s439_s25, 512, %s441_s20, [#allocation9], %s2411_s24, %s2411_s24, %s2410_s21  }
  0x3e   : > { %s474_s14 = sshll.u32 %s1945_s9, 4  ;;  %s500_s18 = scalar_lea.hbm %s2412_s0, %s2131_s28  ;;  %s475_s14 = int_to_ptr.vmem [resolvable:$true] %s474_s14 }
  0x3f   : > { %1480 = dma.hbm_to_vmem [thread:$0]  (!%p2076_p5), %s473_s12, 512, %s475_s14, [#allocation12], %s2411_s24, %s2411_s24, %s2410_s21  }
  0x40   : > { %s502_s1 = sshll.u32 %s500_s18, 4  ;;  %s504_s7 = sshll.u32 %s495_s27, 4  ;;  %s503_s1 = int_to_ptr.hbm [resolvable:$true] %s502_s1  ;;  %s505_s7 = int_to_ptr.vmem [resolvable:$true] %s504_s7 }
  0x41   : > { %s2413_s11 = sand.u32 1, %s1926_s15   ;;  %s539_s17 = scalar_lea.hbm %s2353_s2, %s2131_s28 }
  0x42   : > { %s492_s25 = scalar_lea.sflag [#allocation3], %s2413_s11  ;;  %s541_s5 = sshll.u32 %s539_s17, 4  ;;  %s542_s5 = int_to_ptr.hbm [resolvable:$true] %s541_s5 }
  0x43   : > { %1484 = dma.hbm_to_vmem [thread:$0]  (!%p2139_p8), %s503_s1, 128, %s505_s7, %s492_s25  }
  0x44   : > { %s534_s0 = scalar_lea.vmem [#allocation7], %s2135_s13  ;;  %552 = sbr.rel (%p2068_p3) target bundleno = 1403 (0x57b), region = 72 }
  0x45   : > { %s543_s26 = sshll.u32 %s534_s0, 4  ;;  %s2186_s12 = sand.u32 (!%p2068_p3), 1, %s1922_s30   ;;  %s544_s26 = int_to_ptr.vmem [resolvable:$true] %s543_s26 }
  0x46   : > { %1490 = dma.hbm_to_vmem [thread:$0]  (!%p2139_p8), %s542_s5, 128, %s544_s26, %s512_s16  }
  0x47   : > { %s2189_s7 = sshll.u32 (!%p2068_p3), %s2186_s12, 3  ;;  %s555_s11 = scalar_lea.sflag (!%p2068_p3), [#allocation3], %s2186_s12 }
  0x48   : > { %s558_s28 = scalar_lea.vmem (!%p2068_p3), [#allocation2], %s2189_s7 }
  0x49   : > { %1893 = dma.done.wait (%p2113_p0), %s555_s11, 128  }
  0x4a   : > { %1895 = vsyncadd (%p2113_p0), %s555_s11, 4294967168  ;;  %s564_s0 = sand.u32 1, %s2060_s19   ;;  %s568_s16 = scalar_lea.vmem [#allocation5], %s2189_s7 }
  0x4b   : > { %s565_s29 = scalar_lea.sflag [#allocation6], %s564_s0 }
  0x4c   : > { %1897 = dma.done.wait (%p2113_p0), %s565_s29, 256  }
  0x4d   : > { %1899 = vsyncadd (%p2113_p0), %s565_s29, 4294967040  ;;  %s578_s23 = scalar_lea.vmem [#allocation7], %s2189_s7 }
  0x4e   : > { %1901 = dma.done.wait (%p74_p1), [#allocation9], 1024  }
  0x4f   : > { %1903 = vsyncadd (%p74_p1), [#allocation9], 4294966272 }
  0x50   : > { %1905 = dma.done.wait (%p74_p1), [#allocation12], 1024  }
  0x51   : > { %1907 = vsyncadd (%p74_p1), [#allocation12], 4294966272  ;;  %vm663_vm0 = vcmask 261120   ;;  %v660_v0 = vld [vmem:[%s568_s16] sm:$0xff]  ;;  %v2213_v2 = vld [vmem:[%s558_s28] sm:$0xff]  ;;  %v1946_v4 = vmov 32.0  }
  0x52   : > { %v717_v1 = vsel %vm663_vm0, %v660_v0, 0.0  ;;  %v664_v3 = vsel %vm663_vm0, %v2213_v2, 0.0  ;;  %1576 = vrcp.f32 %v1946_v4  ;;  %v791_v21 = vld [vmem:[#allocation10 + $0x18] sm:$0xff]  ;;  %v790_v23 = vld [vmem:[#allocation10 + $0x10] sm:$0xff]  ;;  %v789_v26 = vld [vmem:[#allocation10 + $0x8] sm:$0xff]  ;;  %vm850_vm14 = vcmask 64512  }
  0x53   : > { %718 = vadd.xlane.f32.xlu0 %v717_v1  ;;  %v822_v22 = vld [vmem:[#allocation11 + $0x18] sm:$0xff]  ;;  %811 = vmatpush.msra.mxu1 %v791_v21  ;;  %v821_v24 = vld [vmem:[#allocation11 + $0x10] sm:$0xff]  ;;  %v820_v27 = vld [vmem:[#allocation11 + $0x8] sm:$0xff]  ;;  %s1947_s18 = smov 112   ;;  %s1948_s25 = smov 120  }
  0x54   : > { %839 = vmatpush.msra.mxu2 %v822_v22  ;;  %v788_v29 = vld [vmem:[#allocation10] sm:$0xff]  ;;  %v760_v39 = vld [vmem:[#allocation8 + $0x18] sm:$0xff]  ;;  %v759_v40 = vld [vmem:[#allocation8 + $0x10] sm:$0xff]  ;;  %s1949_s17 = smov 104   ;;  %s658_s5 = scalar_lea.vmem [#allocation15], %s2189_s7 }
  0x55   : > { %812 = vmatpush.msra.mxu1 %v790_v23  ;;  %v819_v30 = vld [vmem:[#allocation11] sm:$0xff]  ;;  %780 = vmatpush.msra.mxu0 %v760_v39  ;;  %v758_v43 = vld [vmem:[#allocation8 + $0x8] sm:$0xff]  ;;  %v1570_v1 = vld [vmem:[%s2354_s3] ss:$0 sm:$0xff]  ;;  %s1951_s26 = smov 8   ;;  %s1952_s11 = smov 16  }
  0x56   : > { %840 = vmatpush.msra.mxu2 %v821_v24  ;;  %v757_v47 = vld [vmem:[#allocation8] sm:$0xff]  ;;  %v847_v39 = vld [vmem:[%s578_s23] sm:$0xff]  ;;  %s1953_s28 = smov 24   ;;  %s2414_s0 = sld [smem:[#allocation24_spill]] }
  0x57   : > { %813 = vmatpush.msra.mxu1 %v789_v26  ;;  %781 = vmatpush.msra.mxu0 %v759_v40  ;;  %vm848_vm15 = vcmp.eq.f32.partialorder %v847_v39, 0.0  ;;  %v1950_v40 = vmov 0.0   ;;  %s2416_s22 = sld [smem:[#allocation39_spill]]  ;;  %s1197_s21 = sshll.u32 %s658_s5, 4  ;;  %s1198_s21 = int_to_ptr.vmem [resolvable:$true] %s1197_s21 }
  0x58   : > { %v1577_v5 = vpop.eup %1576  ;;  %841 = vmatpush.msra.mxu2 %v820_v27  ;;  %s1169_s14 = scalar_lea.sflag [#allocation16], %s2186_s12 }
  0x59   : > { %v668_v6 = vmul.f32 32.0, %v1577_v5  ;;  %vm672_vm1 = vweird.f32 %v1577_v5  ;;  %814 = vmatpush.msra.mxu1 %v788_v29  ;;  %782 = vmatpush.msra.mxu0 %v758_v43 }
  0x5a   : > { %842 = vmatpush.msra.mxu2 %v819_v30 }
  0x5b   : > { %665 = vadd.xlane.f32.xlu0 %v664_v3  ;;  %v669_v7 = vsub.f32 1.0, %v668_v6  ;;  %783 = vmatpush.msra.mxu0 %v757_v47 }
  0x5c   : > { %s1438_s16 = sshll.u32 %s2414_s0, 3 }
  0x5d   : > { %v670_v8 = vmul.f32 %v1577_v5, %v669_v7  ;;  %s1195_s13 = scalar_lea.hbm %s2416_s22, %s1438_s16  ;;  %s1832_s20 = scalar_lea.hbm %s2416_s22, 16 }
  0x5e   : > { %s1199_s24 = sshll.u32 %s1195_s13, 4  ;;  %s1200_s24 = int_to_ptr.hbm [resolvable:$true] %s1199_s24 }
  0x5f   : > { %v671_v9 = vadd.f32 %v1577_v5, %v670_v8 }
  0x61   : > { %v673_v10 = vsel %vm672_vm1, %v1577_v5, %v671_v9  ;;  %v1571_v9 = vld [vmem:[%s2355_s4] ss:$0 sm:$0xff]  ;;  %vm1124_vm1 = vcmask 130048  }
  0xc6   : > { %v719_v11 = vpop.xlane.xlu0 %718 }
  0xc7   : > { %v720_v12 = vmul.f32 %v719_v11, %v673_v10 }
  0xc9   : > { %v2217_v13 = vsub.f32 %v660_v0, %v720_v12 }
  0xcb   : > { %v722_v14 = vmul.f32 %v2217_v13, %v2217_v13 }
  0xcd   : > { %v723_v15 = vsel %vm663_vm0, %v722_v14, 0.0 }
  0xce   : > { %724 = vadd.xlane.f32.xlu1 %v723_v15  ;;  %v666_v16 = vpop.xlane.xlu0 %665 }
  0xcf   : > { %v674_v17 = vmul.f32 %v673_v10, %v666_v16 }
  0xd1   : > { %v2223_v18 = vsub.f32 %v2213_v2, %v674_v17 }
  0xd3   : > { %v676_v19 = vmul.f32 %v2223_v18, %v2223_v18 }
  0xd5   : > { %v677_v20 = vsel %vm663_vm0, %v676_v19, 0.0 }
  0xd6   : > { %678 = vadd.xlane.f32.xlu1 %v677_v20 }
 0x141   : > { %v725_v25 = vpop.xlane.xlu1 %724 }
 0x142   : > { %v726_v28 = vmul.f32 0.032258064, %v725_v25 }
 0x144   : > { %1578 = vrsqrt.f32 %v726_v28  ;;  %vm734_vm2 = vcmp.eq.f32.partialorder %v726_v28, inf  ;;  %v737_v46 = vand.u32 2147483648, %v726_v28  ;;  %vm736_vm3 = vcmp.eq.f32.partialorder %v726_v28, 0.0 }
 0x149   : > { %v679_v31 = vpop.xlane.xlu1 %678 }
 0x14a   : > { %v1579_v32 = vpop.eup %1578  ;;  %v680_v33 = vmul.f32 0.032258064, %v679_v31 }
 0x14b   : > { %v728_v34 = vmul.f32 %v1579_v32, %v726_v28 }
 0x14c   : > { %1580 = vrsqrt.f32 %v680_v33  ;;  %vm688_vm4 = vcmp.eq.f32.partialorder %v680_v33, inf  ;;  %v691_v55 = vand.u32 2147483648, %v680_v33  ;;  %vm690_vm5 = vcmp.eq.f32.partialorder %v680_v33, 0.0 }
 0x14d   : > { %v729_v35 = vmul.f32 %v1579_v32, %v728_v34 }
 0x14f   : > { %v730_v36 = vmul.f32 0.5, %v729_v35 }
 0x151   : > { %v731_v37 = vsub.f32 1.5, %v730_v36 }
 0x152   : > { %v1581_v38 = vpop.eup %1580 }
 0x153   : > { %v732_v41 = vmul.f32 %v1579_v32, %v731_v37  ;;  %v682_v42 = vmul.f32 %v1581_v38, %v680_v33 }
 0x155   : > { %v733_v44 = vmul.f32 %v732_v41, %v726_v28  ;;  %v683_v45 = vmul.f32 %v1581_v38, %v682_v42  ;;  %v849_v41 = vsel %vm848_vm15, -1e+09, %v1950_v40 }
 0x157   : > { %v735_v48 = vsel %vm734_vm2, %v726_v28, %v733_v44  ;;  %v684_v49 = vmul.f32 0.5, %v683_v45  ;;  %v1573_v28 = vld [vmem:[%s2361_s10] ss:$0 sm:$0xff]  ;;  %vm1126_vm2 = vcmask 195584  }
 0x158   : > { %v738_v50 = vsel %vm736_vm3, %v737_v46, %v735_v48 }
 0x159   : > { %v685_v51 = vsub.f32 1.5, %v684_v49  ;;  %v739_v52 = vadd.f32 1e-06, %v738_v50 }
 0x15b   : > { %v686_v53 = vmul.f32 %v1581_v38, %v685_v51  ;;  %1582 = vrcp.f32 %v739_v52  ;;  %v751_v62 = vand.u32 2147483648, %v739_v52  ;;  %v749_v0 = vand.u32 2147483647, %v739_v52 }
 0x15c   : > { %vm745_vm7 = vweird.f32 %v739_v52 }
 0x15d   : > { %v687_v54 = vmul.f32 %v686_v53, %v680_v33  ;;  %v752_v5 = vor.u32 1.1754944e-38, %v751_v62  ;;  %vm750_vm9 = vcmp.eq.f32.partialorder %v749_v0, 8.507059e+37 }
 0x15f   : > { %v689_v56 = vsel %vm688_vm4, %v680_v33, %v687_v54 }
 0x160   : > { %v692_v57 = vsel %vm690_vm5, %v691_v55, %v689_v56 }
 0x161   : > { %v1583_v58 = vpop.eup %1582  ;;  %v693_v59 = vadd.f32 1e-06, %v692_v57 }
 0x162   : > { %v741_v60 = vmul.f32 %v1583_v58, %v739_v52  ;;  %vm746_vm6 = vweird.f32 %v1583_v58 }
 0x163   : > { %1584 = vrcp.f32 %v693_v59  ;;  %vm747_vm8 = vmor %vm745_vm7, %vm746_vm6  ;;  %v705_v12 = vand.u32 2147483648, %v693_v59  ;;  %v703_v16 = vand.u32 2147483647, %v693_v59  ;;  %vm699_vm11 = vweird.f32 %v693_v59 }
 0x164   : > { %v742_v61 = vsub.f32 1.0, %v741_v60 }
 0x165   : > { %v706_v20 = vor.u32 1.1754944e-38, %v705_v12  ;;  %vm704_vm13 = vcmp.eq.f32.partialorder %v703_v16, 8.507059e+37 }
 0x166   : > { %v743_v63 = vmul.f32 %v1583_v58, %v742_v61 }
 0x168   : > { %v744_v3 = vadd.f32 %v1583_v58, %v743_v63 }
 0x169   : > { %v1585_v4 = vpop.eup %1584 }
 0x16a   : > { %v748_v6 = vsel %vm747_vm8, %v1583_v58, %v744_v3  ;;  %v695_v7 = vmul.f32 %v1585_v4, %v693_v59  ;;  %vm700_vm10 = vweird.f32 %v1585_v4 }
 0x16b   : > { %v753_v8 = vsel %vm750_vm9, %v752_v5, %v748_v6  ;;  %vm701_vm12 = vmor %vm699_vm11, %vm700_vm10 }
 0x16c   : > { %v754_v10 = vmul.f32 %v1570_v1, %v753_v8  ;;  %v696_v11 = vsub.f32 1.0, %v695_v7 }
 0x16e   : > { %v755_v14 = vmul.f32 %v754_v10, %v2217_v13  ;;  %v697_v15 = vmul.f32 %v1585_v4, %v696_v11  ;;  %v1572_v13 = vld [vmem:[%s2359_s8] ss:$0 sm:$0xff] }
 0x170   : > { %v756_v17 = vadd.f32 %v1571_v9, %v755_v14  ;;  %v698_v19 = vadd.f32 %v1585_v4, %v697_v15 }
 0x172   : > { %1421 = vmatmul.msk.f32.vlgmr.msra.gmra.mxu1 %vm663_vm0, %v756_v17  ;;  %1422 = vmatmul.msk.f32.vlgmr.msra.gmra.mxu2 %vm663_vm0, %v756_v17  ;;  %v702_v21 = vsel %vm701_vm12, %v1585_v4, %v698_v19 }
 0x173   : > { %v707_v22 = vsel %vm704_vm13, %v706_v20, %v702_v21 }
 0x174   : > { %v711_v23 = vmul.f32 %v1570_v1, %v707_v22 }
 0x176   : > { %v712_v24 = vmul.f32 %v711_v23, %v2223_v18  ;;  %v1574_v18 = vld [vmem:[%s2357_s6] ss:$0 sm:$0xff] }
 0x178   : > { %v716_v25 = vadd.f32 %v1571_v9, %v712_v24 }
 0x17a   : > { %1420 = vmatmul.msk.f32.vlgmr.msra.gmra.mxu0 %vm663_vm0, %v716_v25 }
 0x1ef   : > { %v816_v26 = vpop.f32.mrf.mxu1 }
 0x1f0   : > { %v817_v27 = vadd.f32 %v1572_v13, %v816_v26 }
 0x1f2   : > { %981 = vrot.lane.b32.xlu2 %v817_v27, %s1947_s18  ;;  %1423 = vmatpush.xpose.msk.msra.mxu3 %vm850_vm14, %v817_v27 }
 0x1f3   : > { %914 = vrot.lane.b32.xlu0 %v817_v27, %s1948_s25 }
 0x1f5   : > { %v844_v29 = vpop.f32.mrf.mxu2 }
 0x1f6   : > { %v2251_v30 = vadd.f32 %v1573_v28, %v844_v29 }
 0x1f7   : > { %v785_v31 = vpop.f32.mrf.mxu0 }
 0x1f8   : > { %v786_v32 = vadd.f32 %v1574_v18, %v785_v31  ;;  %907 = vmatpush.msrb.mxu3 %v2251_v30 }
 0x1fa   : > { %912 = vrot.lane.b32.xlu1 %v786_v32, %s1948_s25  ;;  %979 = vrot.lane.b32.xlu2 %v786_v32, %s1947_s18 }
 0x1fb   : > { %1424 = vmatmul.msk.f32.vlgmr.msra.gmra.mxu3 %vm850_vm14, %v786_v32 }
 0x202   : > { %1047 = vrot.lane.b32.xlu2 %v817_v27, %s1949_s17 }
 0x20a   : > { %1045 = vrot.lane.b32.xlu2 %v786_v32, %s1949_s17 }
 0x24c   : > { %v982_v33 = vpop.permute.xlu2 %981 }
 0x24d   : > { %1429 = vmatpush.xpose.msk.msrb.mxu2 %vm850_vm14, %v982_v33 }
 0x254   : > { %v980_v34 = vpop.permute.xlu2 %979 }
 0x255   : > { %1430 = vmatmul.msk.f32.vlgmr.msrb.gmra.mxu2 %vm850_vm14, %v980_v34  ;;  %v1131_v34 = vld [vmem:[#allocation13 + $0x18] sm:$0xff] }
 0x256   : > { %1151 = vmatpush.msra.mxu2 %v1131_v34 }
 0x25c   : > { %v1048_v36 = vpop.permute.xlu2 %1047 }
 0x264   : > { %v1046_v38 = vpop.permute.xlu2 %1045 }
 0x265   : > { %v915_v35 = vpop.permute.xlu0 %914 }
 0x266   : > { %1426 = vmatpush.xpose.msk.msrb.mxu0 %vm850_vm14, %v915_v35  ;;  %v1130_v35 = vld [vmem:[#allocation13 + $0x10] sm:$0xff] }
 0x267   : > { %1152 = vmatpush.msra.mxu2 %v1130_v35 }
 0x26a   : > { %1432 = vmatpush.xpose.msk.msra.mxu0 %vm850_vm14, %v1048_v36  ;;  %v1129_v36 = vld [vmem:[#allocation13 + $0x8] sm:$0xff] }
 0x26b   : > { %1153 = vmatpush.msra.mxu2 %v1129_v36 }
 0x26c   : > { %v913_v37 = vpop.permute.xlu1 %912 }
 0x26d   : > { %1427 = vmatmul.msk.f32.vlgmr.msrb.gmra.mxu0 %vm850_vm14, %v913_v37  ;;  %v1128_v37 = vld [vmem:[#allocation13] sm:$0xff] }
 0x26e   : > { %1154 = vmatpush.msra.mxu2 %v1128_v37 }
 0x275   : > { %1433 = vmatmul.msk.f32.vlgmr.msra.gmra.mxu0 %vm850_vm14, %v1046_v38 }
 0x27e   : > { %v874_v42 = vpop.f32.mrf.mxu3 }
 0x27f   : > { %v875_v43 = vadd.f32 %v874_v42, %v849_v41 }
 0x281   : > { %v877_v44 = vsel %vm850_vm14, %v875_v43, -inf }
 0x282   : > { %878 = vmax.xlane.f32.xlu2 %v877_v44 }
 0x2d8   : > { %v1004_v45 = vpop.f32.mrf.mxu2 }
 0x2d9   : > { %v1005_v46 = vadd.f32 %v1004_v45, %v849_v41 }
 0x2db   : > { %v1007_v47 = vsel %vm850_vm14, %v1005_v46, -inf }
 0x2dc   : > { %1008 = vmax.xlane.f32.xlu1 %v1007_v47 }
 0x2ea   : > { %v937_v48 = vpop.f32.mrf.mxu0 }
 0x2eb   : > { %v938_v49 = vadd.f32 %v937_v48, %v849_v41 }
 0x2ed   : > { %v940_v50 = vsel %vm850_vm14, %v938_v49, -inf }
 0x2ee   : > { %941 = vmax.xlane.f32.xlu0 %v940_v50 }
 0x2f2   : > { %v1070_v51 = vpop.f32.mrf.mxu0 }
 0x2f3   : > { %v1071_v52 = vadd.f32 %v1070_v51, %v849_v41 }
 0x2f5   : > { %v879_v53 = vpop.xlane.xlu2 %878  ;;  %v1073_v54 = vsel %vm850_vm14, %v1071_v52, -inf }
 0x2f6   : > { %v880_v55 = vsub.f32 %v875_v43, %v879_v53  ;;  %1074 = vmax.xlane.f32.xlu2 %v1073_v54 }
 0x2f8   : > { %v881_v56 = vmul.f32 1.442695, %v880_v55 }
 0x2fa   : > { %1586 = vpow2.f32 %v881_v56 }
 0x300   : > { %v1587_v57 = vpop.eup %1586 }
 0x301   : > { %v883_v58 = vsel %vm850_vm14, %v1587_v57, 0.0 }
 0x302   : > { %884 = vadd.xlane.f32.xlu0 %v883_v58 }
 0x34f   : > { %v1009_v59 = vpop.xlane.xlu1 %1008 }
 0x350   : > { %v1010_v60 = vsub.f32 %v1005_v46, %v1009_v59 }
 0x352   : > { %v1011_v61 = vmul.f32 1.442695, %v1010_v60 }
 0x354   : > { %1588 = vpow2.f32 %v1011_v61 }
 0x35a   : > { %v1589_v62 = vpop.eup %1588 }
 0x35b   : > { %v1013_v63 = vsel %vm850_vm14, %v1589_v62, 0.0 }
 0x35c   : > { %1014 = vadd.xlane.f32.xlu1 %v1013_v63 }
 0x361   : > { %v942_v0 = vpop.xlane.xlu0 %941 }
 0x362   : > { %v943_v1 = vsub.f32 %v938_v49, %v942_v0 }
 0x364   : > { %v944_v3 = vmul.f32 1.442695, %v943_v1 }
 0x366   : > { %1590 = vpow2.f32 %v944_v3 }
 0x369   : > { %v1075_v4 = vpop.xlane.xlu2 %1074 }
 0x36a   : > { %v1076_v5 = vsub.f32 %v1071_v52, %v1075_v4 }
 0x36c   : > { %v1591_v6 = vpop.eup %1590  ;;  %v1077_v7 = vmul.f32 1.442695, %v1076_v5 }
 0x36d   : > { %v946_v8 = vsel %vm850_vm14, %v1591_v6, 0.0 }
 0x36e   : > { %1592 = vpow2.f32 %v1077_v7  ;;  %947 = vadd.xlane.f32.xlu2 %v946_v8 }
 0x374   : > { %v1593_v9 = vpop.eup %1592 }
 0x375   : > { %v885_v10 = vpop.xlane.xlu0 %884  ;;  %1019 = vrot.lane.b32.xlu1 %v2251_v30, %s1947_s18  ;;  %v1079_v11 = vsel %vm850_vm14, %v1593_v9, 0.0  ;;  %s1826_s18 = sshra.s32 %s1200_s24, 4  ;;  %s1827_s18 = int_to_ptr.hbm [resolvable:$true] %s1826_s18 }
 0x376   : > { %1594 = vrcp.f32 %v885_v10  ;;  %1080 = vadd.xlane.f32.xlu0 %v1079_v11  ;;  %s1828_s1 = scalar_lea.hbm %s1827_s18, 8  ;;  %p1833_p10 = scmp.lt.s32.totalorder %s1827_s18, %s2416_s22 }
 0x377   : > { %p1829_p1 = scmp.ne.s32.totalorder %s1827_s18, %s1828_s1  ;;  %p1834_p11 = scmp.lt.s32.totalorder %s1832_s20, %s1828_s1 }
 0x379   : > { %p1830_p3 = pnand %p1829_p1, %p2117_p2  ;;  %p1835_p12 = por %p1834_p11, %p1833_p10 }
 0x37b   : > { %p1831_p5 = pneg %p1830_p3 }
 0x37c   : > { %v1595_v12 = vpop.eup %1594 }
 0x37d   : > { %v887_v14 = vmul.f32 %v1595_v12, %v1587_v57  ;;  %p1836_p13 = pnand %p1835_p12, %p1831_p5 }
 0x37f   : > { %1425 = vmatmul.msk.f32.vlgmr.msrb.gmra.mxu3 %vm850_vm14, %v887_v14 }
 0x386   : > { %953 = vrot.lane.b32.xlu2 %v2251_v30, %s1948_s25 }
 0x38a   : > { %1085 = vrot.lane.b32.xlu0 %v2251_v30, %s1949_s17 }
 0x3cf   : > { %v1015_v15 = vpop.xlane.xlu1 %1014 }
 0x3d0   : > { %1596 = vrcp.f32 %v1015_v15 }
 0x3d6   : > { %v1597_v17 = vpop.eup %1596 }
 0x3d7   : > { %v1017_v19 = vmul.f32 %v1597_v17, %v1589_v62 }
 0x3e1   : > { %v948_v16 = vpop.xlane.xlu2 %947 }
 0x3e2   : > { %1598 = vrcp.f32 %v948_v16 }
 0x3e7   : > { %v1020_v20 = vpop.permute.xlu1 %1019 }
 0x3e8   : > { %v1599_v21 = vpop.eup %1598  ;;  %1040 = vmatpush.msra.mxu3 %v1020_v20 }
 0x3e9   : > { %v954_v22 = vpop.permute.xlu2 %953  ;;  %1431 = vmatmul.msk.f32.vlgmr.msra.gmra.mxu3 %vm850_vm14, %v1017_v19  ;;  %v1081_v23 = vpop.xlane.xlu0 %1080  ;;  %v950_v24 = vmul.f32 %v1599_v21, %v1591_v6 }
 0x3ea   : > { %1600 = vrcp.f32 %v1081_v23  ;;  %974 = vmatpush.msrb.mxu1 %v954_v22 }
 0x3eb   : > { %1428 = vmatmul.msk.f32.vlgmr.msrb.gmra.mxu1 %vm850_vm14, %v950_v24  ;;  %v951_v25 = vadd.f32 %v950_v24, %v887_v14 }
 0x3ed   : > { %v1018_v27 = vadd.f32 %v1017_v19, %v951_v25 }
 0x3f0   : > { %v1601_v13 = vpop.eup %1600 }
 0x3f1   : > { %v1083_v26 = vmul.f32 %v1601_v13, %v1593_v9 }
 0x3f3   : > { %v1084_v28 = vadd.f32 %v1083_v26, %v1018_v27 }
 0x3f5   : > { %v1161_v18 = vmul.f32 0.25, %v1084_v28 }
 0x3f7   : > { %1162 = vst.msk [vmem:[%s658_s5] sm:$0xff] %vm850_vm14, %v1161_v18 }
 0x3fc   : > { %v1086_v29 = vpop.permute.xlu0 %1085 }
 0x3fd   : > { %1106 = vmatpush.msra.mxu1 %v1086_v29 }
 0x3fe   : > { %1434 = vmatmul.msk.f32.vlgmr.msra.gmra.mxu1 %vm850_vm14, %v1083_v26 }
 0x402   : > { %v909_v30 = vpop.f32.mrf.mxu3 }
 0x468   : > { %v976_v31 = vpop.f32.mrf.mxu1 }
 0x469   : > { %1112 = vrot.lane.b32.xlu2 %v976_v31, %s1951_s26 }
 0x46c   : > { %v1042_v32 = vpop.f32.mrf.mxu3 }
 0x46d   : > { %1116 = vrot.lane.b32.xlu0 %v1042_v32, %s1952_s11 }
 0x47b   : > { %v1108_v33 = vpop.f32.mrf.mxu1 }
 0x47c   : > { %1120 = vrot.lane.b32.xlu1 %v1108_v33, %s1953_s28 }
 0x4c3   : > { %v1113_v38 = vpop.permute.xlu2 %1112 }
 0x4c4   : > { %v1123_v40 = vsel %vm850_vm14, %v909_v30, %v1113_v38 }
 0x4df   : > { %v1117_v39 = vpop.permute.xlu0 %1116 }
 0x4e0   : > { %v1125_v41 = vsel %vm1124_vm1, %v1123_v40, %v1117_v39 }
 0x4ee   : > { %v1121_v42 = vpop.permute.xlu1 %1120 }
 0x4ef   : > { %v1127_v43 = vsel %vm1126_vm2, %v1125_v41, %v1121_v42 }
 0x4f0   : > { %1435 = vmatmul.msk.f32.vlgmr.msra.gmra.mxu2 %vm663_vm0, %v1127_v43 }
 0x4f1   : > { %1839 = shalt.err (!%p1836_p13)
}
 0x4f2   : > { %1465 = dma.vmem_to_hbm [thread:$0]  (%p2117_p2), %s1198_s21, 128, %s1200_s24, %s1169_s14  }
 0x4f3   : > { %s2417_s11 = sld [smem:[#allocation37_spill]]  ;;  %s651_s13 = scalar_lea.vmem [#allocation14], %s2189_s7 }
 0x4f4   : > { %s2418_s23 = sld [smem:[#allocation38_spill]]  ;;  %s1182_s18 = sshll.u32 %s651_s13, 4  ;;  %s1183_s18 = int_to_ptr.vmem [resolvable:$true] %s1182_s18 }
 0x4f5   : > { %s1164_s21 = scalar_lea.sflag [#allocation4], %s2186_s12 }
 0x4f9   : > { %v1575_v44 = vld [vmem:[%s2417_s11] ss:$0 sm:$0xff] }
 0x4fa   : > { %s1180_s19 = scalar_lea.hbm %s2418_s23, %s1438_s16  ;;  %s1860_s7 = scalar_lea.hbm %s2418_s23, 16 }
 0x4fb   : > { %s1184_s1 = sshll.u32 %s1180_s19, 4  ;;  %s1185_s1 = int_to_ptr.hbm [resolvable:$true] %s1184_s1 }
 0x4fc   : > { %s1854_s24 = sshra.s32 %s1185_s1, 4  ;;  %s1855_s24 = int_to_ptr.hbm [resolvable:$true] %s1854_s24 }
 0x4fd   : > { %s1856_s14 = scalar_lea.hbm %s1855_s24, 8  ;;  %p1861_p8 = scmp.lt.s32.totalorder %s1855_s24, %s2418_s23 }
 0x4fe   : > { %p1857_p0 = scmp.ne.s32.totalorder %s1855_s24, %s1856_s14  ;;  %p1862_p1 = scmp.lt.s32.totalorder %s1860_s7, %s1856_s14 }
 0x500   : > { %p1858_p4 = pnand %p1857_p0, %p2117_p2  ;;  %p1863_p3 = por %p1862_p1, %p1861_p8 }
 0x502   : > { %p1859_p9 = pneg %p1858_p4 }
 0x504   : > { %p1864_p5 = pnand %p1863_p3, %p1859_p9 }
 0x573   : > { %v1156_v45 = vpop.f32.mrf.mxu2 }
 0x574   : > { %v1157_v46 = vadd.f32 %v1575_v44, %v1156_v45 }
 0x576   : > { %v1159_v47 = vadd.f32 %v1157_v46, %v2213_v2 }
 0x578   : > { %1160 = vst.msk [vmem:[%s651_s13] sm:$0xff] %vm663_vm0, %v1159_v47 }
 0x579   : > { %1867 = shalt.err (!%p1864_p5)
}
 0x57a   : > { %1464 = dma.vmem_to_hbm [thread:$0]  (%p2117_p2), %s1183_s18, 128, %s1185_s1, %s1164_s21  }
 0x57b PF: > { %s2419_s12 = sld [smem:[#allocation23_spill]]  ;;  %p1492_p10 = pnand %p1403_p6, %p2124_p7 }
 0x57c   : > { %s2421_s17 = sld [smem:[#allocation26_spill]] }
 0x57d   : > { %p1493_p11 = pneg %p1492_p10 }
 0x581   : > { %s1211_s5 = sand.u32 1, %s2419_s12  }
 0x582   : > { %s1212_s26 = scalar_lea.sflag [#allocation4], %s1211_s5 }
 0x583   : > { %1909 = dma.done.wait (%p1493_p11), %s1212_s26, 128  }
 0x584   : > { %1911 = vsyncadd (%p1493_p11), %s1212_s26, 4294967168  ;;  %s1222_s11 = scalar_lea.sflag [#allocation16], %s1211_s5 }
 0x585   : > { %1913 = dma.done.wait (%p1493_p11), %s1222_s11, 128  }
 0x586   : > { %1915 = vsyncadd (%p1493_p11), %s1222_s11, 4294967168  ;;  %s39_s18 = sadd.s32 1, %s2421_s17   ;;  %s2422_s28 = sld [smem:[#allocation29_spill]] }
 0x587   : > { %p36_p12 = scmp.ge.s32.totalorder %s39_s18, 4   ;;  %s2423_s16 = sld [smem:[#allocation25_spill]] }
 0x588   : > { %s2424_s17 = sld [smem:[#allocation27_spill]]  ;;  %s2425_s29 = smov %s1922_s30 }
 0x589   : > { %s2426_s30 = smov %s1926_s15  ;;  %38 = sbr.rel (!%p36_p12) target bundleno = 22 (0x16), region = 174 }
 0x58c   : > { %s2427_s15 = smov %s2422_s28 }
 0x58e   :  { %1228 = vsyncpa [#allocation3], 1 }
 0x58f   :  { %1230 = vsyncpa [#allocation3 + $0x1], 1 }
 0x590   :  { %1231 = vsyncpa [#allocation6], 1 }
 0x591   :  { %1233 = vsyncpa [#allocation6 + $0x1], 1 }
 0x592   :  { %1234 = vsyncpa [#allocation9], 1 }
 0x593   :  { %1235 = vsyncpa [#allocation12], 1 }
 0x594   :  { %1236 = vsyncpa [#allocation4], 1 }
 0x595   :  { %1238 = vsyncpa [#allocation4 + $0x1], 1 }
 0x596   :  { %1239 = vsyncpa [#allocation16], 1 }
 0x597   :  { %1241 = vsyncpa [#allocation16 + $0x1], 1 }

</bundles_post_ra>
